<compile_context>
chip_gen: v5e
topology: v5e:2x2
jax: 0.10.0
libtpu: 0.0.40
codegen_flags: <defaults>
</compile_context>

<pallas_src>
import functools

import jax
import jax.numpy as jnp
import numpy as np
from jax.experimental import pallas as pl
from jax.experimental.pallas import tpu as pltpu

_MiB = 1024 * 1024


def _adaptive_avg_pool_matrix(h, w, th, tw):
    """Averaging matrix P of shape (TH*TW, H*W): pooled = P @ y_flat."""
    def bins(in_size, out_size):
        starts = (np.arange(out_size) * in_size) // out_size
        ends = -((-(np.arange(out_size) + 1) * in_size) // out_size)  # ceil
        return starts, ends

    hs, he = bins(h, th)
    ws, we = bins(w, tw)
    p = np.zeros((th * tw, h * w), dtype=np.float32)
    for oh in range(th):
        for ow in range(tw):
            cnt = (he[oh] - hs[oh]) * (we[ow] - ws[ow])
            for ih in range(hs[oh], he[oh]):
                for iw in range(ws[ow], we[ow]):
                    p[oh * tw + ow, ih * w + iw] = 1.0 / cnt
    return p


def _pad_up(v, m):
    return -(-v // m) * m


def _vmem_capacity_bytes():
    """Per-TensorCore VMEM capacity; conservative (v7x) fallback if unknown."""
    try:
        cap = int(getattr(pltpu.get_tpu_info(), "vmem_capacity_bytes", 0))
        if cap > 0:
            return cap
    except Exception:
        pass
    return 64 * _MiB


def _pick_tiles(n, cin, cout, hw, p_out, in_itemsize, out_itemsize, budget):
    """Choose (nb, t_hw, n_hw_blocks, est_vmem_bytes) under a VMEM budget.

    Accounts for ALL live VMEM: double-buffered x / pool-matrix / weights /
    bias / output blocks, the (t_hw, Cout) conv intermediate and the f32
    accumulator.  Prefers shrinking nb before tiling HW, caps nb at 8, and
    keeps >= 2 batch grid steps so both v7x TensorCores get work.
    """
    def total(nb, t_hw, hw_blocks):
        x_b = nb * _pad_up(cin, 8) * _pad_up(t_hw, 128) * in_itemsize
        p_b = _pad_up(p_out, 8) * _pad_up(t_hw, 128) * in_itemsize
        w_b = _pad_up(cin, 8) * _pad_up(cout, 128) * in_itemsize
        b_b = 8 * _pad_up(cout, 128) * 4
        o_b = nb * _pad_up(p_out, 8) * _pad_up(cout, 128) * out_itemsize
        acc_b = 0 if hw_blocks == 1 else nb * _pad_up(p_out, 8) * _pad_up(cout, 128) * 4
        y_b = _pad_up(t_hw, 8) * _pad_up(cout, 128) * 4        # conv intermediate
        return 2 * (x_b + p_b + w_b + b_b + o_b) + acc_b + 2 * y_b

    nb_cap = min(n, 8)
    if n >= 2:
        nb_cap = min(nb_cap, n // 2)   # >= 2 "parallel" batch steps (v7x megacore)
    nb_cap = max(nb_cap, 1)

    # Prefer full-HW blocks (no reduction axis; pool matrix / weights resident).
    for nb in range(nb_cap, 0, -1):
        if n % nb == 0 and total(nb, hw, 1) <= budget:
            return nb, hw, 1, total(nb, hw, 1)

    # HW-reduction fallback for huge feature maps: nb=1, largest 128-aligned
    # HW tile that fits; wrapper zero-pads HW up to a multiple of t_hw.
    t_hw = max(128, (_pad_up(hw, 128) // 2 // 128) * 128)
    while t_hw > 128 and total(1, t_hw, 2) > budget:
        t_hw -= 128
    n_blocks = -(-hw // t_hw)
    return 1, t_hw, n_blocks, total(1, t_hw, n_blocks)


def _make_kernel(nb, n_hw_blocks):
    """Fused 1x1 conv + bias + ReLU + adaptive-avg-pool over one (nb, t_hw) block."""

    def conv_relu_pool(x_ref, w_ref, b_ref, p_ref, i):
        x_i = x_ref[i]                                              # (Cin, t_hw)
        # 1x1 conv, contracting Cin -> (t_hw, Cout); f32 accumulation on MXU.
        y = jax.lax.dot_general(
            x_i, w_ref[...], (((0,), (0,)), ((), ())),
            preferred_element_type=jnp.float32)
        y = jnp.maximum(y + b_ref[...].astype(jnp.float32), 0.0)    # bias + ReLU (VPU)
        # Adaptive avg pool: (P, t_hw) @ (t_hw, Cout) -> (P, Cout); Cout on lanes.
        return jnp.dot(p_ref[...], y.astype(p_ref.dtype),
                       preferred_element_type=jnp.float32)

    if n_hw_blocks == 1:
        # Common case: single HW block -> no reduction axis, no scratch.
        def kernel(x_ref, w_ref, b_ref, p_ref, o_ref):
            for i in range(nb):   # nb <= 8: bounded unroll; the grid covers the rest
                o_ref[i] = conv_relu_pool(x_ref, w_ref, b_ref, p_ref, i).astype(o_ref.dtype)
    else:
        def kernel(x_ref, w_ref, b_ref, p_ref, o_ref, acc_ref):
            j = pl.program_id(1)

            @pl.when(j == 0)
            def _init():
                acc_ref[...] = jnp.zeros_like(acc_ref)

            for i in range(nb):
                acc_ref[i] += conv_relu_pool(x_ref, w_ref, b_ref, p_ref, i)

            @pl.when(j == pl.num_programs(1) - 1)
            def _finalize():
                o_ref[...] = acc_ref[...].astype(o_ref.dtype)

    return kernel


@functools.partial(jax.jit, static_argnames=("target_size", "use_bf16"))
def feature_align(x_nchw, weight, bias, target_size=(7, 7), use_bf16=False):
    """x: (N, Cin, H, W); weight: (Cout, Cin) or (Cout, Cin, 1, 1); bias: (Cout,)."""
    n, cin, h, w = x_nchw.shape
    cout = weight.shape[0]
    th, tw = target_size
    hw = h * w
    p_out = th * tw

    out_dtype = x_nchw.dtype
    compute_dtype = jnp.bfloat16 if use_bf16 else x_nchw.dtype

    # NCHW-native view: (N, Cin, H*W) -- no HBM transpose of the activations.
    x = x_nchw.reshape(n, cin, hw).astype(compute_dtype)
    w_t = weight.reshape(cout, cin).T.astype(compute_dtype)         # (Cin, Cout)
    b_row = bias.reshape(1, cout).astype(jnp.float32)               # (1, Cout)
    p_np = _adaptive_avg_pool_matrix(h, w, th, tw)                  # (P, HW)

    in_itemsize = jnp.dtype(compute_dtype).itemsize
    out_itemsize = jnp.dtype(out_dtype).itemsize
    cap = _vmem_capacity_bytes()
    budget = max(16 * _MiB, cap // 2 - 8 * _MiB)   # ~56 MiB on v5e/v6e, ~24 MiB on v7x
    nb, t_hw, n_hw_blocks, vmem_need = _pick_tiles(
        n, cin, cout, hw, p_out, in_itemsize, out_itemsize, budget)

    hw_padded = t_hw * n_hw_blocks
    if hw_padded != hw:
        # Zero-pad HW so t_hw divides it; padded pool-matrix columns are zero,
        # so the padded activations never contribute to the pooled output.
        x = jnp.pad(x, ((0, 0), (0, 0), (0, hw_padded - hw)))
        p_np = np.pad(p_np, ((0, 0), (0, hw_padded - hw)))
    p_mat = jnp.asarray(p_np, dtype=compute_dtype)

    vmem_limit = int(min(cap - 8 * _MiB, max(32 * _MiB, 2 * vmem_need)))

    cost = pl.CostEstimate(
        flops=2 * n * hw * cin * cout + 2 * n * hw * cout * p_out,
        transcendentals=0,
        bytes_accessed=(x.size + w_t.size + p_mat.size) * in_itemsize
        + b_row.size * 4 + n * p_out * cout * out_itemsize,
    )

    kernel = _make_kernel(nb, n_hw_blocks)
    scratch = [] if n_hw_blocks == 1 else [pltpu.VMEM((nb, p_out, cout), jnp.float32)]

    out_npc = pl.pallas_call(
        kernel,
        out_shape=jax.ShapeDtypeStruct((n, p_out, cout), out_dtype),
        grid_spec=pltpu.PrefetchScalarGridSpec(
            num_scalar_prefetch=0,
            grid=(n // nb, n_hw_blocks),
            in_specs=[
                pl.BlockSpec((nb, cin, t_hw), lambda b, j: (b, 0, j)),   # x
                pl.BlockSpec((cin, cout), lambda b, j: (0, 0)),          # W^T
                pl.BlockSpec((1, cout), lambda b, j: (0, 0)),            # bias
                pl.BlockSpec((p_out, t_hw), lambda b, j: (0, j)),        # pool matrix
            ],
            out_specs=pl.BlockSpec((nb, p_out, cout), lambda b, j: (b, 0, 0)),
            scratch_shapes=scratch,
        ),
        compiler_params=pltpu.CompilerParams(
            dimension_semantics=("parallel", "arbitrary"),
            vmem_limit_bytes=vmem_limit,
        ),
        cost_estimate=cost,
    )(x, w_t, b_row, p_mat)

    # (N, P, Cout) -> (N, Cout, P) -> (N, Cout, TH, TW): tiny wrapper transpose.
    return out_npc.transpose(0, 2, 1).reshape(n, cout, th, tw)


def _reference_f64(x_nchw, weight, bias, target_size=(7, 7)):
    """Plain numpy float64 reference of the same forward (no TPU matmul modes)."""
    x = np.asarray(x_nchw, np.float64)
    n, cin, h, w = x.shape
    cout = weight.shape[0]
    th, tw = target_size
    w_mat = np.asarray(weight, np.float64).reshape(cout, cin)
    b = np.asarray(bias, np.float64)
    y = np.einsum("nchw,oc->nohw", x, w_mat) + b[None, :, None, None]
    y = np.maximum(y, 0.0)
    p = _adaptive_avg_pool_matrix(h, w, th, tw).astype(np.float64)   # (P, HW)
    out = np.einsum("ncq,pq->ncp", y.reshape(n, cout, h * w), p)
    return out.reshape(n, cout, th, tw)


if __name__ == "__main__":
    key = jax.random.PRNGKey(0)
    k_x, k_w, k_b = jax.random.split(key, 3)

    N, Cin, H, W = 2, 16, 16, 16
    Cout = 128                     # small stand-in for the module default 512
    target = (7, 7)

    x = jax.random.normal(k_x, (N, Cin, H, W), dtype=jnp.float32)
    weight = jax.random.normal(k_w, (Cout, Cin, 1, 1), dtype=jnp.float32) / np.sqrt(Cin)
    bias = jax.random.normal(k_b, (Cout,), dtype=jnp.float32) * 0.01

    ref = _reference_f64(np.asarray(x), np.asarray(weight), np.asarray(bias), target)

    out = jax.block_until_ready(feature_align(x, weight, bias, target_size=target))
    assert out.shape == (N, Cout, target[0], target[1]), out.shape
    # Tolerance covers the TPU MXU's reduced-precision f32 matmul modes.
    np.testing.assert_allclose(np.asarray(out, np.float64), ref, rtol=2e-2, atol=2e-2)

    # Optional bf16-MXU-input fast path (f32 accumulation): looser tolerance.
    out_bf16 = jax.block_until_ready(
        feature_align(x, weight, bias, target_size=target, use_bf16=True))
    np.testing.assert_allclose(np.asarray(out_bf16, np.float64), ref, rtol=6e-2, atol=6e-2)

    print("KERNEL_OK")
</pallas_src>

<mosaic_0001>
module attributes {stable_mosaic.version = 11 : i64} {
  func.func @kernel(%arg0: i32, %arg1: i32, %arg2: memref<1x16x256xf32, #tpu.memory_space<vmem>>, %arg3: memref<16x128xf32, #tpu.memory_space<vmem>>, %arg4: memref<1x128xf32, #tpu.memory_space<vmem>>, %arg5: memref<49x256xf32, #tpu.memory_space<vmem>>, %arg6: memref<1x49x128xf32, #tpu.memory_space<vmem>>) attributes {dimension_semantics = [#tpu.dimension_semantics<parallel>, #tpu.dimension_semantics<arbitrary>], iteration_bounds = array<i64: 2, 1>, scalar_prefetch = 0 : i64, scratch_operands = 0 : i64, tpu.core_type = #tpu.core_type<tc>, window_params = [{transform_indices = @transform_0, window_bounds = array<i64: 1, 16, 256>}, {pipeline_mode = #tpu.pipeline_mode<synchronous>, transform_indices = @transform_1, window_bounds = array<i64: 16, 128>}, {pipeline_mode = #tpu.pipeline_mode<synchronous>, transform_indices = @transform_2, window_bounds = array<i64: 1, 128>}, {transform_indices = @transform_3, window_bounds = array<i64: 49, 256>}, {transform_indices = @transform_4, window_bounds = array<i64: 1, 49, 128>}]} {
    %c0 = arith.constant 0 : index
    %c0_0 = arith.constant 0 : index
    %c0_1 = arith.constant 0 : index
    %0 = vector.load %arg2[%c0, %c0_0, %c0_1] : memref<1x16x256xf32, #tpu.memory_space<vmem>>, vector<1x16x256xf32>
    %1 = vector.shape_cast %0 : vector<1x16x256xf32> to vector<16x256xf32>
    %c0_2 = arith.constant 0 : index
    %c0_3 = arith.constant 0 : index
    %2 = vector.load %arg3[%c0_2, %c0_3] : memref<16x128xf32, #tpu.memory_space<vmem>>, vector<16x128xf32>
    %cst = arith.constant dense<0.000000e+00> : vector<256x128xf32>
    %3 = tpu.matmul %1, %2, %cst {dimension_numbers = #tpu.dot_dimension_numbers<[0], [0], [1], [1], [0, 1, 1, 1], [], []>} : vector<16x256xf32>, vector<16x128xf32>, vector<256x128xf32> -> vector<256x128xf32>
    %c0_4 = arith.constant 0 : index
    %c0_5 = arith.constant 0 : index
    %4 = vector.load %arg4[%c0_4, %c0_5] : memref<1x128xf32, #tpu.memory_space<vmem>>, vector<1x128xf32>
    %5 = vector.broadcast %4 : vector<1x128xf32> to vector<256x128xf32>
    %6 = arith.addf %3, %5 : vector<256x128xf32>
    %cst_6 = arith.constant 0.000000e+00 : f32
    %7 = vector.broadcast %cst_6 : f32 to vector<256x128xf32>
    %8 = arith.maximumf %6, %7 : vector<256x128xf32>
    %c0_7 = arith.constant 0 : index
    %c0_8 = arith.constant 0 : index
    %9 = vector.load %arg5[%c0_7, %c0_8] : memref<49x256xf32, #tpu.memory_space<vmem>>, vector<49x256xf32>
    %cst_9 = arith.constant dense<0.000000e+00> : vector<49x128xf32>
    %10 = tpu.matmul %9, %8, %cst_9 {dimension_numbers = #tpu.dot_dimension_numbers<[1], [0], [0], [1], [0, 0, 1, 1], [], []>} : vector<49x256xf32>, vector<256x128xf32>, vector<49x128xf32> -> vector<49x128xf32>
    %c0_10 = arith.constant 0 : index
    %c0_11 = arith.constant 0 : index
    %c0_12 = arith.constant 0 : index
    %11 = vector.load %arg6[%c0_10, %c0_11, %c0_12] : memref<1x49x128xf32, #tpu.memory_space<vmem>>, vector<1x49x128xf32>
    %12 = vector.shape_cast %11 : vector<1x49x128xf32> to vector<49x128xf32>
    %13 = vector.shape_cast %10 : vector<49x128xf32> to vector<1x49x128xf32>
    tpu.vector_store %arg6[%c0_10, %c0_11, %c0_12], %13 {strides = array<i32>} : memref<1x49x128xf32, #tpu.memory_space<vmem>>, vector<1x49x128xf32>,
    return
  }
  func.func @transform_0(%arg0: i32, %arg1: i32) -> (i32, i32, i32) {
    %c0_i32 = arith.constant 0 : i32
    %c0_i32_0 = arith.constant 0 : i32
    return %arg0, %c0_i32, %arg1 : i32, i32, i32
  }
  func.func @transform_1(%arg0: i32, %arg1: i32) -> (i32, i32) {
    %c0_i32 = arith.constant 0 : i32
    %c0_i32_0 = arith.constant 0 : i32
    %c0_i32_1 = arith.constant 0 : i32
    return %c0_i32, %c0_i32_0 : i32, i32
  }
  func.func @transform_2(%arg0: i32, %arg1: i32) -> (i32, i32) {
    %c0_i32 = arith.constant 0 : i32
    %c0_i32_0 = arith.constant 0 : i32
    %c0_i32_1 = arith.constant 0 : i32
    return %c0_i32, %c0_i32_0 : i32, i32
  }
  func.func @transform_3(%arg0: i32, %arg1: i32) -> (i32, i32) {
    %c0_i32 = arith.constant 0 : i32
    %c0_i32_0 = arith.constant 0 : i32
    return %c0_i32, %arg1 : i32, i32
  }
  func.func @transform_4(%arg0: i32, %arg1: i32) -> (i32, i32, i32) {
    %c0_i32 = arith.constant 0 : i32
    %c0_i32_0 = arith.constant 0 : i32
    %c0_i32_1 = arith.constant 0 : i32
    return %arg0, %c0_i32, %c0_i32_0 : i32, i32, i32
  }
}

</mosaic_0001>

<bundles_post_ra>
// kernel: feature_align.1
= control target key start
LH: loop header
LB: loop body
LE: loop exit
PB: predicated region body
PF: predicated region fallthrough
CT: control target
= control target key end

     0   :  { %s870_s15 = smov 0   ;;  %s872_s16 = smov 0   ;;  %s1060_s0 = inlined_call_operand.vmem [shape: f32[2,16,256], index: 0, kind: input, shape index: {}]   ;;  %s1061_s1 = inlined_call_operand.vmem [shape: f32[16,128], index: 1, kind: input, shape index: {}]   ;;  %s1062_s2 = inlined_call_operand.vmem [shape: f32[1,128], index: 2, kind: input, shape index: {}]   ;;  %s1063_s3 = inlined_call_operand.vmem [shape: f32[49,256], index: 3, kind: input, shape index: {}]   ;;  %s1064_s4 = inlined_call_operand.vmem [shape: f32[2,49,128], index: 4, kind: output, shape index: {}]  }
   0x1   :  { %s874_s17 = smov 0  }
   0x2 LB: > { %s26_s18 = sadd.s32 1, %s839_s16  ;;  %p751_p0 = scmp.ge.s32.totalorder %s843_s17, 1  ;;  %s843_s17 = sphi %s874_s17, %s14_s17   ;;  %s839_s16 = sphi %s872_s16, %s1066_s16   ;;  %s835_s15 = sphi %s870_s15, %s1065_s15  }
   0x3   : > { %p28_p1 = scmp.ge.s32.totalorder %s26_s18, 2  ;;  %p192_p2 = scmp.lt.s32.totalorder %s843_s17, 3 }
   0x5   : > { %s1068_s18 = smov (%p28_p1, %s26_s18), 0  ;;  %p193_p3 = pnand %p751_p0, %p192_p2 }
   0x6   : > { %p228_p4 = scmp.lt.s32.totalorder (!%p193_p3), %s835_s15, 1 }
   0x7   : > { %196 = sbr.rel (%p193_p3) target bundleno = 651 (0x28b), region = 36 }
   0xc   : > { %s1070_s15 = smov (!%p228_p4, %s835_s15), 1  ;;  %v253_v4 = vld [vmem:[%s1061_s1 + $0x8] sm:$0xff]  ;;  %v252_v5 = vld [vmem:[%s1061_s1] sm:$0xff]  ;;  %vm322_vm0 = vcmask 130048  }
   0xd   : > { %s789_s19 = sshll.u32 %s1070_s15, 5  ;;  %433 = vmatpush.msra.mxu0 %v253_v4  ;;  %791 = vmatpush.msra.mxu3 %v253_v4  ;;  %s794_s9 = smul.u32 56, %s1070_s15 }
   0xe   : > { %s235_s22 = scalar_lea.vmem %s1060_s0, %s789_s19  ;;  %790 = vmatpush.msra.mxu1 %v253_v4 }
   0xf   : > { %v249_v0 = vld [vmem:[%s235_s22 + $0x8] sm:$0xff]  ;;  %v248_v1 = vld [vmem:[%s235_s22] sm:$0xff]  ;;  %v251_v2 = vld [vmem:[%s235_s22 + $0x18] sm:$0xff]  ;;  %434 = vmatpush.msra.mxu0 %v252_v5  ;;  %793 = vmatpush.msra.mxu3 %v252_v5  ;;  %s247_s12 = scalar_lea.vmem %s1064_s4, %s794_s9 }
  0x10   : > { %290 = vxpose.xlu0.b32.start [1/2] (short) %v249_v0, 128  ;;  %258 = vxpose.xlu1.b32.start [1/2] (short) %v248_v1, 128  ;;  %v250_v3 = vld [vmem:[%s235_s22 + $0x10] sm:$0xff]  ;;  %v957_v0 = vld [vmem:[%s1062_s2] ss:$0 sm:$0xff] }
  0x11   : > { %792 = vmatpush.msra.mxu1 %v252_v5 }
  0x18   : > { %291 = vxpose.xlu0.b32.end [2/2] (short) %v251_v2, 128  ;;  %259 = vxpose.xlu1.b32.end [2/2] (short) %v250_v3, 128 }
  0xb4   : > { %v306_v6 = vpop.trf.xlu0  ;;  %v274_v7 = vpop.trf.xlu1 }
  0xb5   : > { %755 = vmatmul.msk.f32.vlgmr.msra.gmra.mxu0 %vm322_vm0, %v274_v7 }
  0xbc   : > { %v307_v8 = vpop.trf.xlu0  ;;  %v275_v9 = vpop.trf.xlu1 }
  0xbd   : > { %756 = vmatmul.msk.f32.gmra.mxu0 %vm322_vm0, %v275_v9 }
  0xc4   : > { %v308_v10 = vpop.trf.xlu0  ;;  %v276_v11 = vpop.trf.xlu1 }
  0xc5   : > { %757 = vmatmul.msk.f32.gmra.mxu0 %vm322_vm0, %v276_v11 }
  0xcc   : > { %v309_v12 = vpop.trf.xlu0  ;;  %v277_v13 = vpop.trf.xlu1 }
  0xcd   : > { %774 = vmatmul.msk.f32.vlgmr.msra.gmra.mxu3 %vm322_vm0, %v309_v12  ;;  %758 = vmatmul.msk.f32.gmra.mxu0 %vm322_vm0, %v277_v13 }
  0xd4   : > { %v310_v14 = vpop.trf.xlu0  ;;  %v278_v15 = vpop.trf.xlu1 }
  0xd5   : > { %775 = vmatmul.msk.f32.gmra.mxu3 %vm322_vm0, %v310_v14  ;;  %759 = vmatmul.msk.f32.gmra.mxu0 %vm322_vm0, %v278_v15 }
  0xdc   : > { %v311_v16 = vpop.trf.xlu0  ;;  %v279_v17 = vpop.trf.xlu1 }
  0xdd   : > { %776 = vmatmul.msk.f32.gmra.mxu3 %vm322_vm0, %v311_v16  ;;  %760 = vmatmul.msk.f32.gmra.mxu0 %vm322_vm0, %v279_v17 }
  0xe4   : > { %v312_v18 = vpop.trf.xlu0  ;;  %v280_v19 = vpop.trf.xlu1 }
  0xe5   : > { %777 = vmatmul.msk.f32.gmra.mxu3 %vm322_vm0, %v312_v18  ;;  %761 = vmatmul.msk.f32.gmra.mxu0 %vm322_vm0, %v280_v19 }
  0xec   : > { %v313_v20 = vpop.trf.xlu0  ;;  %v281_v21 = vpop.trf.xlu1 }
  0xed   : > { %778 = vmatmul.msk.f32.gmra.mxu3 %vm322_vm0, %v313_v20  ;;  %762 = vmatmul.msk.f32.gmra.mxu0 %vm322_vm0, %v281_v21 }
  0xf4   : > { %v314_v22 = vpop.trf.xlu0  ;;  %v282_v23 = vpop.trf.xlu1 }
  0xf5   : > { %779 = vmatmul.msk.f32.gmra.mxu3 %vm322_vm0, %v314_v22  ;;  %763 = vmatmul.msk.f32.gmra.mxu0 %vm322_vm0, %v282_v23 }
  0xfc   : > { %v315_v24 = vpop.trf.xlu0  ;;  %v283_v25 = vpop.trf.xlu1 }
  0xfd   : > { %780 = vmatmul.msk.f32.gmra.mxu3 %vm322_vm0, %v315_v24  ;;  %764 = vmatmul.msk.f32.gmra.mxu0 %vm322_vm0, %v283_v25 }
 0x104   : > { %v316_v26 = vpop.trf.xlu0  ;;  %v284_v27 = vpop.trf.xlu1 }
 0x105   : > { %781 = vmatmul.msk.f32.gmra.mxu3 %vm322_vm0, %v316_v26  ;;  %765 = vmatmul.msk.f32.gmra.mxu0 %vm322_vm0, %v284_v27 }
 0x10c   : > { %v317_v28 = vpop.trf.xlu0  ;;  %v285_v29 = vpop.trf.xlu1 }
 0x10d   : > { %782 = vmatmul.msk.f32.gmra.mxu3 %vm322_vm0, %v317_v28  ;;  %766 = vmatmul.msk.f32.gmra.mxu0 %vm322_vm0, %v285_v29 }
 0x114   : > { %v318_v30 = vpop.trf.xlu0  ;;  %v286_v31 = vpop.trf.xlu1 }
 0x115   : > { %783 = vmatmul.msk.f32.gmra.mxu3 %vm322_vm0, %v318_v30  ;;  %767 = vmatmul.msk.f32.gmra.mxu0 %vm322_vm0, %v286_v31 }
 0x11c   : > { %v319_v32 = vpop.trf.xlu0  ;;  %v287_v33 = vpop.trf.xlu1 }
 0x11d   : > { %784 = vmatmul.msk.f32.gmra.mxu3 %vm322_vm0, %v319_v32  ;;  %768 = vmatmul.msk.f32.gmra.mxu0 %vm322_vm0, %v287_v33 }
 0x124   : > { %v320_v34 = vpop.trf.xlu0  ;;  %v288_v35 = vpop.trf.xlu1 }
 0x125   : > { %769 = vmatmul.msk.f32.vlgmr.msra.gmra.mxu1 %vm322_vm0, %v288_v35  ;;  %785 = vmatmul.msk.f32.gmra.mxu3 %vm322_vm0, %v320_v34 }
 0x12c   : > { %v321_v36 = vpop.trf.xlu0  ;;  %v289_v37 = vpop.trf.xlu1 }
 0x12d   : > { %770 = vmatmul.msk.f32.gmra.mxu1 %vm322_vm0, %v289_v37  ;;  %786 = vmatmul.msk.f32.gmra.mxu3 %vm322_vm0, %v321_v36 }
 0x132   : > { %v929_v38 = vpop.f32.mrf.mxu0 }
 0x135   : > { %771 = vmatmul.msk.f32.gmra.mxu1 %vm322_vm0, %v306_v6 }
 0x13a   : > { %v932_v39 = vpop.f32.mrf.mxu0 }
 0x13d   : > { %772 = vmatmul.msk.f32.gmra.mxu1 %vm322_vm0, %v307_v8 }
 0x142   : > { %v935_v40 = vpop.f32.mrf.mxu0 }
 0x145   : > { %773 = vmatmul.msk.f32.gmra.mxu1 %vm322_vm0, %v308_v10 }
 0x14a   : > { %v938_v41 = vpop.f32.mrf.mxu0 }
 0x150   : > { %v940_v42 = vpop.f32.mrf.mxu3 }
 0x152   : > { %v942_v43 = vpop.f32.mrf.mxu0 }
 0x158   : > { %v944_v44 = vpop.f32.mrf.mxu3 }
 0x15a   : > { %v946_v45 = vpop.f32.mrf.mxu0 }
 0x15b   : > { %v452_v36 = vadd.f32 %v957_v0, %v946_v45 }
 0x15d   : > { %v537_v45 = vmax.f32 %v452_v36, 0.0 }
 0x160   : > { %v948_v46 = vpop.f32.mrf.mxu3 }
 0x162   : > { %v454_v47 = vpop.f32.mrf.mxu0 }
 0x163   : > { %v455_v31 = vadd.f32 %v957_v0, %v454_v47 }
 0x165   : > { %v538_v47 = vmax.f32 %v455_v31, 0.0 }
 0x168   : > { %v950_v48 = vpop.f32.mrf.mxu3 }
 0x16a   : > { %v457_v49 = vpop.f32.mrf.mxu0 }
 0x16b   : > { %v458_v27 = vadd.f32 %v957_v0, %v457_v49 }
 0x16d   : > { %v539_v37 = vmax.f32 %v458_v27, 0.0 }
 0x170   : > { %v952_v50 = vpop.f32.mrf.mxu3 }
 0x172   : > { %v460_v51 = vpop.f32.mrf.mxu0 }
 0x173   : > { %v461_v23 = vadd.f32 %v957_v0, %v460_v51 }
 0x175   : > { %v540_v32 = vmax.f32 %v461_v23, 0.0 }
 0x178   : > { %v508_v52 = vpop.f32.mrf.mxu3 }
 0x179   : > { %v509_v49 = vadd.f32 %v957_v0, %v508_v52  ;;  %v503_v52 = vadd.f32 %v957_v0, %v950_v48  ;;  %v497_v48 = vadd.f32 %v957_v0, %v944_v44 }
 0x17a   : > { %v463_v54 = vpop.f32.mrf.mxu0 }
 0x17b   : > { %v464_v19 = vadd.f32 %v957_v0, %v463_v54  ;;  %v449_v54 = vadd.f32 %v957_v0, %v942_v43  ;;  %v443_v43 = vadd.f32 %v957_v0, %v935_v40  ;;  %v437_v40 = vadd.f32 %v957_v0, %v929_v38  ;;  %v564_v38 = vld [vmem:[%s1063_s3] sm:$0xff] }
 0x17d   : > { %v541_v28 = vmax.f32 %v464_v19, 0.0  ;;  %v532_v44 = vmax.f32 %v437_v40, 0.0  ;;  %v576_v19 = vld [vmem:[%s1063_s3 + $0x60] sm:$0x1] }
 0x180   : > { %v511_v53 = vpop.f32.mrf.mxu3 }
 0x181   : > { %v512_v33 = vadd.f32 %v957_v0, %v511_v53  ;;  %v506_v53 = vadd.f32 %v957_v0, %v952_v50  ;;  %v500_v50 = vadd.f32 %v957_v0, %v948_v46  ;;  %v494_v46 = vadd.f32 %v957_v0, %v940_v42 }
 0x182   : > { %v466_v56 = vpop.f32.mrf.mxu0 }
 0x183   : > { %v467_v15 = vadd.f32 %v957_v0, %v466_v56  ;;  %v446_v56 = vadd.f32 %v957_v0, %v938_v41  ;;  %v440_v41 = vadd.f32 %v957_v0, %v932_v39  ;;  %v552_v39 = vmax.f32 %v497_v48, 0.0 }
 0x185   : > { %v542_v24 = vmax.f32 %v467_v15, 0.0  ;;  %v572_v15 = vld [vmem:[%s1063_s3 + $0x40] sm:$0xff] }
 0x188   : > { %v514_v55 = vpop.f32.mrf.mxu3 }
 0x189   : > { %v515_v29 = vadd.f32 %v957_v0, %v514_v55  ;;  %v557_v55 = vmax.f32 %v512_v33, 0.0 }
 0x18a   : > { %v469_v58 = vpop.f32.mrf.mxu0 }
 0x18b   : > { %v470_v10 = vadd.f32 %v957_v0, %v469_v58  ;;  %v558_v51 = vmax.f32 %v515_v29, 0.0  ;;  %v536_v58 = vmax.f32 %v449_v54, 0.0 }
 0x18d   : > { %v543_v20 = vmax.f32 %v470_v10, 0.0  ;;  %v566_v10 = vld [vmem:[%s1063_s3 + $0x10] sm:$0xff] }
 0x190   : > { %v517_v57 = vpop.f32.mrf.mxu3 }
 0x191   : > { %v518_v25 = vadd.f32 %v957_v0, %v517_v57  ;;  %v556_v57 = vmax.f32 %v509_v49, 0.0 }
 0x192   : > { %v472_v60 = vpop.f32.mrf.mxu0 }
 0x193   : > { %v473_v7 = vadd.f32 %v957_v0, %v472_v60  ;;  %v559_v34 = vmax.f32 %v518_v25, 0.0  ;;  %v535_v60 = vmax.f32 %v446_v56, 0.0 }
 0x195   : > { %v544_v16 = vmax.f32 %v473_v7, 0.0 }
 0x198   : > { %v520_v59 = vpop.f32.mrf.mxu3 }
 0x199   : > { %v521_v21 = vadd.f32 %v957_v0, %v520_v59  ;;  %v555_v59 = vmax.f32 %v506_v53, 0.0 }
 0x19a   : > { %v475_v1 = vpop.f32.mrf.mxu0 }
 0x19b   : > { %v476_v5 = vadd.f32 %v957_v0, %v475_v1  ;;  %v560_v30 = vmax.f32 %v521_v21, 0.0  ;;  %v553_v1 = vmax.f32 %v500_v50, 0.0 }
 0x19d   : > { %v545_v11 = vmax.f32 %v476_v5, 0.0 }
 0x1a0   : > { %v523_v61 = vpop.f32.mrf.mxu3 }
 0x1a1   : > { %v524_v17 = vadd.f32 %v957_v0, %v523_v61  ;;  %v554_v61 = vmax.f32 %v503_v52, 0.0 }
 0x1a2   : > { %v478_v62 = vpop.f32.mrf.mxu1 }
 0x1a3   : > { %v479_v3 = vadd.f32 %v957_v0, %v478_v62  ;;  %v561_v26 = vmax.f32 %v524_v17, 0.0  ;;  %v574_v17 = vld [vmem:[%s1063_s3 + $0x50] sm:$0xff] }
 0x1a5   : > { %v546_v8 = vmax.f32 %v479_v3, 0.0 }
 0x1a8   : > { %v526_v63 = vpop.f32.mrf.mxu3 }
 0x1a9   : > { %v527_v12 = vadd.f32 %v957_v0, %v526_v63  ;;  %v534_v63 = vmax.f32 %v443_v43, 0.0 }
 0x1aa   : > { %v481_v2 = vpop.f32.mrf.mxu1 }
 0x1ab   : > { %v482_v4 = vadd.f32 %v957_v0, %v481_v2  ;;  %v562_v22 = vmax.f32 %v527_v12, 0.0  ;;  %v533_v2 = vmax.f32 %v440_v41, 0.0  ;;  %v569_v12 = vld [vmem:[%s1063_s3 + $0x28] sm:$0xff] }
 0x1ad   : > { %v547_v6 = vmax.f32 %v482_v4, 0.0  ;;  %v551_v4 = vmax.f32 %v494_v46, 0.0 }
 0x1af   : > { %578 = vmatpush.msrb.mxu1 %v547_v6 }
 0x1b0   : > { %v529_v9 = vpop.f32.mrf.mxu3 }
 0x1b1   : > { %579 = vmatpush.msrb.mxu1 %v546_v8  ;;  %v530_v13 = vadd.f32 %v957_v0, %v529_v9  ;;  %v565_v9 = vld [vmem:[%s1063_s3 + $0x8] sm:$0xff] }
 0x1b2   : > { %v966_v14 = vpop.f32.mrf.mxu1 }
 0x1b3   : > { %580 = vmatpush.msrb.mxu1 %v545_v11  ;;  %v563_v18 = vmax.f32 %v530_v13, 0.0  ;;  %v485_v42 = vadd.f32 %v957_v0, %v966_v14  ;;  %v568_v11 = vld [vmem:[%s1063_s3 + $0x20] sm:$0xff]  ;;  %v570_v13 = vld [vmem:[%s1063_s3 + $0x30] sm:$0xff]  ;;  %v571_v14 = vld [vmem:[%s1063_s3 + $0x38] sm:$0xff] }
 0x1b5   : > { %581 = vmatpush.msrb.mxu1 %v544_v16  ;;  %616 = vmatpush.msra.mxu2 %v563_v18  ;;  %v548_v8 = vmax.f32 %v485_v42, 0.0  ;;  %v573_v16 = vld [vmem:[%s1063_s3 + $0x48] sm:$0xff]  ;;  %v575_v18 = vld [vmem:[%s1063_s3 + $0x58] sm:$0xff] }
 0x1b7   : > { %582 = vmatpush.msrb.mxu1 %v543_v20  ;;  %617 = vmatpush.msra.mxu2 %v562_v22  ;;  %v577_v20 = vld [vmem:[%s1063_s3 + $0x68] sm:$0x1] }
 0x1b9   : > { %583 = vmatpush.msrb.mxu1 %v542_v24  ;;  %618 = vmatpush.msra.mxu2 %v561_v26 }
 0x1ba   : > { %v487_v35 = vpop.f32.mrf.mxu1 }
 0x1bb   : > { %584 = vmatpush.msrb.mxu1 %v541_v28  ;;  %619 = vmatpush.msra.mxu2 %v560_v30  ;;  %v488_v5 = vadd.f32 %v957_v0, %v487_v35 }
 0x1bd   : > { %585 = vmatpush.msrb.mxu1 %v540_v32  ;;  %620 = vmatpush.msra.mxu2 %v559_v34  ;;  %v549_v7 = vmax.f32 %v488_v5, 0.0 }
 0x1bf   : > { %586 = vmatpush.msrb.mxu1 %v539_v37  ;;  %621 = vmatpush.msra.mxu2 %v558_v51 }
 0x1c1   : > { %587 = vmatpush.msrb.mxu1 %v538_v47  ;;  %622 = vmatpush.msra.mxu2 %v557_v55 }
 0x1c2   : > { %v490_v62 = vpop.f32.mrf.mxu1 }
 0x1c3   : > { %588 = vmatpush.msrb.mxu1 %v537_v45  ;;  %623 = vmatpush.msra.mxu2 %v556_v57  ;;  %v491_v3 = vadd.f32 %v957_v0, %v490_v62  ;;  %v567_v0 = vld [vmem:[%s1063_s3 + $0x18] sm:$0xff] }
 0x1c5   : > { %589 = vmatpush.msrb.mxu1 %v536_v58  ;;  %624 = vmatpush.msra.mxu2 %v555_v59  ;;  %v550_v6 = vmax.f32 %v491_v3, 0.0 }
 0x1c7   : > { %590 = vmatpush.msrb.mxu1 %v535_v60  ;;  %625 = vmatpush.msra.mxu2 %v554_v61 }
 0x1c9   : > { %591 = vmatpush.msrb.mxu1 %v534_v63  ;;  %626 = vmatpush.msra.mxu2 %v553_v1 }
 0x1cb   : > { %592 = vmatpush.msrb.mxu1 %v533_v2  ;;  %627 = vmatpush.msra.mxu2 %v552_v39 }
 0x1cd   : > { %593 = vmatpush.msrb.mxu1 %v532_v44  ;;  %628 = vmatpush.msra.mxu2 %v551_v4 }
 0x1ce   : > { %594 = vmatmul.f32.vlgmr.msrb.gmra.mxu1 %v564_v38 }
 0x1cf   : > { %629 = vmatpush.msra.mxu2 %v550_v6 }
 0x1d1   : > { %630 = vmatpush.msra.mxu2 %v549_v7 }
 0x1d3   : > { %631 = vmatpush.msra.mxu2 %v548_v8 }
 0x1d4   : > { %632 = vmatmul.f32.vlgmr.msra.gmra.mxu2 %v565_v9 }
 0x1d6   : > { %597 = vmatmul.f32.gmra.mxu1 %v566_v10 }
 0x1dc   : > { %635 = vmatmul.f32.gmra.mxu2 %v567_v0 }
 0x1de   : > { %600 = vmatmul.f32.gmra.mxu1 %v568_v11 }
 0x1e4   : > { %638 = vmatmul.f32.gmra.mxu2 %v569_v12 }
 0x1e6   : > { %603 = vmatmul.f32.gmra.mxu1 %v570_v13 }
 0x1ec   : > { %641 = vmatmul.f32.gmra.mxu2 %v571_v14 }
 0x1ee   : > { %606 = vmatmul.f32.gmra.mxu1 %v572_v15 }
 0x1f4   : > { %644 = vmatmul.f32.gmra.mxu2 %v573_v16 }
 0x1f6   : > { %609 = vmatmul.f32.gmra.mxu1 %v574_v17 }
 0x1fc   : > { %647 = vmatmul.f32.gmra.mxu2 %v575_v18 }
 0x1fe   : > { %612 = vmatmul.f32.gmra.mxu1 %v576_v19 }
 0x204   : > { %650 = vmatmul.f32.gmra.mxu2 %v577_v20 }
 0x24b   : > { %v595_v21 = vpop.f32.mrf.mxu1 }
 0x253   : > { %v598_v22 = vpop.f32.mrf.mxu1 }
 0x257   : > { %v633_v23 = vpop.f32.mrf.mxu2 }
 0x258   : > { %v634_v24 = vadd.f32 %v633_v23, %v595_v21 }
 0x25a   : > { %654 = vst [vmem:[%s247_s12] sm:$0xff] %v634_v24 }
 0x25b   : > { %v601_v25 = vpop.f32.mrf.mxu1 }
 0x25f   : > { %v636_v26 = vpop.f32.mrf.mxu2 }
 0x260   : > { %v637_v27 = vadd.f32 %v636_v26, %v598_v22 }
 0x262   : > { %655 = vst [vmem:[%s247_s12 + $0x8] sm:$0xff] %v637_v27 }
 0x263   : > { %v604_v29 = vpop.f32.mrf.mxu1 }
 0x267   : > { %v639_v28 = vpop.f32.mrf.mxu2 }
 0x268   : > { %v640_v30 = vadd.f32 %v639_v28, %v601_v25 }
 0x26a   : > { %656 = vst [vmem:[%s247_s12 + $0x10] sm:$0xff] %v640_v30 }
 0x26b   : > { %v607_v33 = vpop.f32.mrf.mxu1 }
 0x26f   : > { %v642_v31 = vpop.f32.mrf.mxu2 }
 0x270   : > { %v643_v32 = vadd.f32 %v642_v31, %v604_v29 }
 0x272   : > { %657 = vst [vmem:[%s247_s12 + $0x18] sm:$0xff] %v643_v32 }
 0x273   : > { %v610_v36 = vpop.f32.mrf.mxu1 }
 0x277   : > { %v645_v34 = vpop.f32.mrf.mxu2 }
 0x278   : > { %v646_v35 = vadd.f32 %v645_v34, %v607_v33 }
 0x27a   : > { %658 = vst [vmem:[%s247_s12 + $0x20] sm:$0xff] %v646_v35 }
 0x27b   : > { %v613_v51 = vpop.f32.mrf.mxu1 }
 0x27f   : > { %v648_v37 = vpop.f32.mrf.mxu2 }
 0x280   : > { %v649_v49 = vadd.f32 %v648_v37, %v610_v36 }
 0x282   : > { %659 = vst [vmem:[%s247_s12 + $0x28] sm:$0xff] %v649_v49 }
 0x287   : > { %v651_v54 = vpop.f32.mrf.mxu2 }
 0x288   : > { %v652_v47 = vadd.f32 %v651_v54, %v613_v51 }
 0x28a   : > { %660 = vst [vmem:[%s247_s12 + $0x30] sm:$0x1] %v652_v47 }
 0x28b PF: > { %s14_s17 = sadd.s32 1, %s843_s17   ;;  %s1065_s15 = smov %s839_s16 }
 0x28c   : > { %p11_p5 = scmp.ge.s32.totalorder %s14_s17, 4   ;;  %s1066_s16 = smov %s1068_s18 }
 0x28e   :  { %13 = sbr.rel (!%p11_p5) target bundleno = 2 (0x2), region = 69 }

</bundles_post_ra>
